<compile_context>
chip_gen: v6e
topology: v6e:2x2x1
jax: 0.10.0
libtpu: 0.0.40
codegen_flags: <defaults>
</compile_context>

<pallas_src>
import functools

import jax
import jax.numpy as jnp
from jax import lax
from jax.experimental import pallas as pl
from jax.experimental.pallas import tpu as pltpu


def _round_up(a, b):
    return ((a + b - 1) // b) * b


def _cdiv(a, b):
    return (a + b - 1) // b


def _vmem_capacity_bytes():
    try:
        return int(pltpu.get_tpu_info().vmem_capacity_bytes)
    except Exception:
        return 64 * 1024 * 1024  # conservative default (v7x per-core VMEM)


def _pick_bk(h4, block_k):
    """Largest multiple of 128 that divides h4 and is <= block_k (else h4)."""
    if h4 <= block_k:
        return h4
    if h4 % 128 == 0:
        cand = (min(block_k, h4) // 128) * 128
        while cand >= 128:
            if h4 % cand == 0:
                return cand
            cand -= 128
    return h4  # no clean divisor: fall back to full intermediate width


def _mlp_kernel(x_ref, w1_ref, b1_ref, w2t_ref, b2_ref, o_ref, acc_ref,
                *, bk, resident):
    """One (i, k) grid step of the fused MLP.

    x_ref  : (bm, H)
    w1_ref : (bk, H) streamed   | (4H, H) resident (row-sliced in kernel)
    b1_ref : (1, bk) f32        (always streamed -- tiny)
    w2t_ref: (bk, H) streamed   | (4H, H) resident (row-sliced in kernel)
             (W2 transposed: (4H, H), so the 2nd dot is standard orientation)
    b2_ref : (1, H) f32
    o_ref  : (bm, H)
    acc_ref: (bm, H) f32 scratch; persists across the k (reduction) axis
    """
    k = pl.program_id(1)

    @pl.when(k == 0)
    def _():
        acc_ref[...] = jnp.zeros_like(acc_ref)

    if resident:
        off = pl.multiple_of(k * bk, bk)
        w1_blk = w1_ref[pl.ds(off, bk), :]
        w2t_blk = w2t_ref[pl.ds(off, bk), :]
    else:
        w1_blk = w1_ref[...]
        w2t_blk = w2t_ref[...]

    # linear1 (one bk-slice of the intermediate dim): contract hidden axis of x
    # with hidden axis of W1 (stored (4H, H)) -> (bm, bk), f32 accumulation.
    h = lax.dot_general(
        x_ref[...], w1_blk,
        dimension_numbers=(((1,), (1,)), ((), ())),
        preferred_element_type=jnp.float32,
    ) + b1_ref[...]

    # exact GELU: 0.5 * h * (1 + erf(h / sqrt(2)))  (matches nn.GELU() default)
    h = 0.5 * h * (1.0 + lax.erf(h * 0.7071067811865476))

    # linear2 partial sum: (bm, bk) @ (bk, H) -> (bm, H); accumulate in f32.
    acc_ref[...] += lax.dot_general(
        h.astype(w2t_blk.dtype), w2t_blk,
        dimension_numbers=(((1,), (0,)), ((), ())),
        preferred_element_type=jnp.float32,
    )

    @pl.when(k == pl.num_programs(1) - 1)
    def _():
        o_ref[...] = (acc_ref[...] + b2_ref[...]).astype(o_ref.dtype)


def prepare_mlp_params(w1, b1, w2, b2, *, matmul_dtype=jnp.bfloat16):
    """One-time (model-load-time) weight reformat: cast + transpose W2.

    Accepts PyTorch nn.Linear layouts: w1 (4H, H), b1 (4H,), w2 (H, 4H),
    b2 (H,). Do this ONCE so the per-step path never re-casts / re-transposes
    weights (each of those is a full HBM pass). bf16 runs the MXU at full rate
    and halves weight DMA; pass matmul_dtype=jnp.float32 for exact f32 parity.
    """
    h4, h = w1.shape
    assert w2.shape == (h, h4) and b1.shape == (h4,) and b2.shape == (h,)
    dt = w1.dtype if matmul_dtype is None else matmul_dtype
    return {
        "w1": jnp.asarray(w1).astype(dt),           # (4H, H)
        "w2t": jnp.asarray(w2).T.astype(dt),        # (4H, H) == W2^T
        "b1": jnp.asarray(b1).reshape(1, h4).astype(jnp.float32),
        "b2": jnp.asarray(b2).reshape(1, h).astype(jnp.float32),
    }


@functools.partial(jax.jit,
                   static_argnames=("block_m", "block_k", "weights_resident"))
def bert_mlp(x, params, *, block_m=512, block_k=1024, weights_resident=None):
    """x: (B, S, H). params: output of prepare_mlp_params."""
    w1, w2t, b1, b2 = params["w1"], params["w2t"], params["b1"], params["b2"]
    B, S, H = x.shape
    H4 = w1.shape[0]
    assert w1.shape == (H4, H) and w2t.shape == (H4, H)
    M = B * S
    out_dtype = x.dtype

    x2d = x.reshape(M, H).astype(w1.dtype)  # matmul dtype follows the weights

    # ---- tile sizes -------------------------------------------------------
    bm = _round_up(min(block_m, M), 8)
    # v7x megacore: ensure >= 2 i-tiles when there's enough work so both
    # TensorCores get a share of the 'parallel' M axis.
    if M >= 256 and _cdiv(M, bm) < 2:
        bm = _round_up(_cdiv(M, 2), 8)
    M_pad = _round_up(M, bm)
    if M_pad != M:
        # TODO(synk): mask the ragged tail in-kernel instead of padding x.
        x2d = jnp.pad(x2d, ((0, M_pad - M), (0, 0)))
    n_i = M_pad // bm

    bk = _pick_bk(H4, block_k)
    n_k = H4 // bk

    # ---- sizes / VMEM budget ---------------------------------------------
    isz = x2d.dtype.itemsize
    wsz = w1.dtype.itemsize
    osz = jnp.dtype(out_dtype).itemsize
    weight_bytes = 2 * H4 * H * wsz            # W1 + W2^T, one copy each

    vmem_cap = _vmem_capacity_bytes()
    act_vmem = (2 * bm * H * isz               # x tile (double-buffered)
                + 2 * bm * H * osz             # out tile
                + bm * H * 4                   # f32 accumulator scratch
                + 2 * (bk + H) * 4             # bias slices
                + 2 * bm * bk * 4)             # GELU intermediate headroom
    resident_vmem = act_vmem + 2 * weight_bytes          # 2 buffers per weight
    streamed_vmem = act_vmem + 2 * 2 * bk * H * wsz      # double-buffered blocks
    if weights_resident is None:
        weights_resident = resident_vmem <= int(0.70 * vmem_cap)
    vmem_est = resident_vmem if weights_resident else streamed_vmem
    vmem_limit = min(max(int(vmem_est * 1.25) + (1 << 20), 32 * 1024 * 1024),
                     int(0.95 * vmem_cap))

    # ---- BlockSpecs -------------------------------------------------------
    x_spec = pl.BlockSpec((bm, H), lambda i, k: (i, 0))
    b1_spec = pl.BlockSpec((1, bk), lambda i, k: (0, k))
    b2_spec = pl.BlockSpec((1, H), lambda i, k: (0, 0))
    o_spec = pl.BlockSpec((bm, H), lambda i, k: (i, 0))
    if weights_resident:
        # Full weights stay in VMEM for the whole grid (constant index_map ->
        # fetched once, never re-streamed); the kernel row-slices per k step.
        w1_spec = pl.BlockSpec((H4, H), lambda i, k: (0, 0))
        w2_spec = pl.BlockSpec((H4, H), lambda i, k: (0, 0))
    else:
        # Stream (bk, H) row-blocks of both weights along the k axis.
        w1_spec = pl.BlockSpec((bk, H), lambda i, k: (k, 0))
        w2_spec = pl.BlockSpec((bk, H), lambda i, k: (k, 0))

    kernel = functools.partial(_mlp_kernel, bk=bk, resident=weights_resident)

    cost = pl.CostEstimate(
        flops=4 * M_pad * H * H4,              # two matmuls
        transcendentals=M_pad * H4,            # erf per intermediate element
        bytes_accessed=(M_pad * H * isz + M_pad * H * osz + (H4 + H) * 4
                        + weight_bytes * (1 if weights_resident else n_i)),
    )

    out = pl.pallas_call(
        kernel,
        out_shape=jax.ShapeDtypeStruct((M_pad, H), out_dtype),
        grid_spec=pltpu.PrefetchScalarGridSpec(
            num_scalar_prefetch=0,
            grid=(n_i, n_k),
            in_specs=[x_spec, w1_spec, b1_spec, w2_spec, b2_spec],
            out_specs=o_spec,
            scratch_shapes=[pltpu.VMEM((bm, H), jnp.float32)],
        ),
        compiler_params=pltpu.CompilerParams(
            dimension_semantics=("parallel", "arbitrary"),
            vmem_limit_bytes=vmem_limit,
        ),
        cost_estimate=cost,
    )(x2d, w1, b1, w2t, b2)

    if M_pad != M:
        out = out[:M]
    return out.reshape(B, S, H)


def _reference(x, w1, b1, w2, b2):
    h = jnp.einsum("bsh,fh->bsf", x, w1) + b1
    h = jax.nn.gelu(h, approximate=False)
    return jnp.einsum("bsf,hf->bsh", h, w2) + b2


if __name__ == "__main__":
    # config: hidden_size=32 -> intermediate = 4*32 = 128
    batch, seq, hidden = 2, 8, 32
    inter = 4 * hidden

    key = jax.random.PRNGKey(0)
    kx, k1, k2, k3, k4 = jax.random.split(key, 5)

    x = jax.random.normal(kx, (batch, seq, hidden), dtype=jnp.float32)
    w1 = jax.random.normal(k1, (inter, hidden), dtype=jnp.float32) / jnp.sqrt(float(hidden))
    b1 = jax.random.normal(k2, (inter,), dtype=jnp.float32) * 0.02
    w2 = jax.random.normal(k3, (hidden, inter), dtype=jnp.float32) / jnp.sqrt(float(inter))
    b2 = jax.random.normal(k4, (hidden,), dtype=jnp.float32) * 0.02

    ref = _reference(x, w1, b1, w2, b2)

    # Exact f32 path: parity with the PyTorch module in f32.
    p_f32 = prepare_mlp_params(w1, b1, w2, b2, matmul_dtype=jnp.float32)
    out = jax.block_until_ready(bert_mlp(x, p_f32))
    assert out.shape == (batch, seq, hidden)
    assert jnp.allclose(out, ref, atol=1e-4, rtol=1e-4), "f32 path mismatch"

    # bf16-MXU default path (f32 accumulation): looser tolerance.
    p_bf16 = prepare_mlp_params(w1, b1, w2, b2)   # bf16 weights by default
    out_bf = jax.block_until_ready(bert_mlp(x, p_bf16))
    assert jnp.allclose(out_bf, ref, atol=5e-2, rtol=5e-2), "bf16 path mismatch"

    # Ragged token count exercises the padded-M tail handling.
    x_rag = jax.random.normal(kx, (3, 5, hidden), dtype=jnp.float32)
    out_rag = jax.block_until_ready(bert_mlp(x_rag, p_f32))
    ref_rag = _reference(x_rag, w1, b1, w2, b2)
    assert jnp.allclose(out_rag, ref_rag, atol=1e-4, rtol=1e-4), "ragged mismatch"

    # Force the streamed-weights fallback (large-model path) as well.
    out_str = jax.block_until_ready(bert_mlp(x, p_f32, weights_resident=False))
    assert jnp.allclose(out_str, ref, atol=1e-4, rtol=1e-4), "streamed path mismatch"

    print("KERNEL_OK")
</pallas_src>

<mosaic_0001>
module attributes {stable_mosaic.version = 11 : i64} {
  func.func @_mlp_kernel(%arg0: i32, %arg1: i32, %arg2: memref<16x32xf32, #tpu.memory_space<vmem>>, %arg3: memref<128x32xf32, #tpu.memory_space<vmem>>, %arg4: memref<1x128xf32, #tpu.memory_space<vmem>>, %arg5: memref<128x32xf32, #tpu.memory_space<vmem>>, %arg6: memref<1x32xf32, #tpu.memory_space<vmem>>, %arg7: memref<16x32xf32, #tpu.memory_space<vmem>>, %arg8: memref<16x32xf32, #tpu.memory_space<vmem>>) attributes {dimension_semantics = [#tpu.dimension_semantics<parallel>, #tpu.dimension_semantics<arbitrary>], iteration_bounds = array<i64: 1, 1>, scalar_prefetch = 0 : i64, scratch_operands = 1 : i64, tpu.core_type = #tpu.core_type<tc>, window_params = [{transform_indices = @transform_0, window_bounds = array<i64: 16, 32>}, {pipeline_mode = #tpu.pipeline_mode<synchronous>, transform_indices = @transform_1, window_bounds = array<i64: 128, 32>}, {transform_indices = @transform_2, window_bounds = array<i64: 1, 128>}, {pipeline_mode = #tpu.pipeline_mode<synchronous>, transform_indices = @transform_3, window_bounds = array<i64: 128, 32>}, {pipeline_mode = #tpu.pipeline_mode<synchronous>, transform_indices = @transform_4, window_bounds = array<i64: 1, 32>}, {transform_indices = @transform_5, window_bounds = array<i64: 16, 32>}]} {
    %c0_i32 = arith.constant 0 : i32
    %0 = arith.cmpi eq, %arg1, %c0_i32 : i32
    %1 = arith.extui %0 : i1 to i32
    %c0_i32_0 = arith.constant 0 : i32
    %2 = arith.cmpi ne, %1, %c0_i32_0 : i32
    scf.if %2 {
      %cst_16 = arith.constant 0.000000e+00 : f32
      %29 = vector.broadcast %cst_16 : f32 to vector<16x32xf32>
      %c0_17 = arith.constant 0 : index
      %c0_18 = arith.constant 0 : index
      %30 = vector.load %arg8[%c0_17, %c0_18] : memref<16x32xf32, #tpu.memory_space<vmem>>, vector<16x32xf32>
      tpu.vector_store %arg8[%c0_17, %c0_18], %29 {strides = array<i32>} : memref<16x32xf32, #tpu.memory_space<vmem>>, vector<16x32xf32>,
    } else {
    }
    %c128_i32 = arith.constant 128 : i32
    %3 = arith.muli %arg1, %c128_i32 : i32
    %4 = tpu.assume_multiple %3, 128 : i32
    %5 = arith.index_cast %4 : i32 to index
    %c0 = arith.constant 0 : index
    %6 = vector.load %arg3[%5, %c0] : memref<128x32xf32, #tpu.memory_space<vmem>>, vector<128x32xf32>
    %7 = arith.index_cast %4 : i32 to index
    %c0_1 = arith.constant 0 : index
    %8 = vector.load %arg5[%7, %c0_1] : memref<128x32xf32, #tpu.memory_space<vmem>>, vector<128x32xf32>
    %c0_2 = arith.constant 0 : index
    %c0_3 = arith.constant 0 : index
    %9 = vector.load %arg2[%c0_2, %c0_3] : memref<16x32xf32, #tpu.memory_space<vmem>>, vector<16x32xf32>
    %cst = arith.constant dense<0.000000e+00> : vector<16x128xf32>
    %10 = tpu.matmul %9, %6, %cst {dimension_numbers = #tpu.dot_dimension_numbers<[1], [1], [0], [0], [0, 0, 1, 0], [], []>} : vector<16x32xf32>, vector<128x32xf32>, vector<16x128xf32> -> vector<16x128xf32>
    %c0_4 = arith.constant 0 : index
    %c0_5 = arith.constant 0 : index
    %11 = vector.load %arg4[%c0_4, %c0_5] : memref<1x128xf32, #tpu.memory_space<vmem>>, vector<1x128xf32>
    %12 = vector.broadcast %11 : vector<1x128xf32> to vector<16x128xf32>
    %13 = arith.addf %10, %12 : vector<16x128xf32>
    %cst_6 = arith.constant 5.000000e-01 : f32
    %14 = vector.broadcast %cst_6 : f32 to vector<16x128xf32>
    %15 = arith.mulf %14, %13 : vector<16x128xf32>
    %cst_7 = arith.constant 0.707106769 : f32
    %16 = vector.broadcast %cst_7 : f32 to vector<16x128xf32>
    %17 = arith.mulf %13, %16 : vector<16x128xf32>
    %18 = math.erf %17 : vector<16x128xf32>
    %cst_8 = arith.constant 1.000000e+00 : f32
    %19 = vector.broadcast %cst_8 : f32 to vector<16x128xf32>
    %20 = arith.addf %19, %18 : vector<16x128xf32>
    %21 = arith.mulf %15, %20 : vector<16x128xf32>
    %c0_9 = arith.constant 0 : index
    %c0_10 = arith.constant 0 : index
    %22 = vector.load %arg8[%c0_9, %c0_10] : memref<16x32xf32, #tpu.memory_space<vmem>>, vector<16x32xf32>
    %cst_11 = arith.constant dense<0.000000e+00> : vector<16x32xf32>
    %23 = tpu.matmul %21, %8, %cst_11 {dimension_numbers = #tpu.dot_dimension_numbers<[1], [0], [0], [1], [0, 0, 1, 1], [], []>} : vector<16x128xf32>, vector<128x32xf32>, vector<16x32xf32> -> vector<16x32xf32>
    %24 = arith.addf %22, %23 : vector<16x32xf32>
    %c0_12 = arith.constant 0 : index
    %c0_13 = arith.constant 0 : index
    %25 = vector.load %arg8[%c0_12, %c0_13] : memref<16x32xf32, #tpu.memory_space<vmem>>, vector<16x32xf32>
    tpu.vector_store %arg8[%c0_12, %c0_13], %24 {strides = array<i32>} : memref<16x32xf32, #tpu.memory_space<vmem>>, vector<16x32xf32>,
    %c0_i32_14 = arith.constant 0 : i32
    %26 = arith.cmpi eq, %arg1, %c0_i32_14 : i32
    %27 = arith.extui %26 : i1 to i32
    %c0_i32_15 = arith.constant 0 : i32
    %28 = arith.cmpi ne, %27, %c0_i32_15 : i32
    scf.if %28 {
      %c0_16 = arith.constant 0 : index
      %c0_17 = arith.constant 0 : index
      %29 = vector.load %arg8[%c0_16, %c0_17] : memref<16x32xf32, #tpu.memory_space<vmem>>, vector<16x32xf32>
      %c0_18 = arith.constant 0 : index
      %c0_19 = arith.constant 0 : index
      %30 = vector.load %arg6[%c0_18, %c0_19] : memref<1x32xf32, #tpu.memory_space<vmem>>, vector<1x32xf32>
      %31 = vector.broadcast %30 : vector<1x32xf32> to vector<16x32xf32>
      %32 = arith.addf %29, %31 : vector<16x32xf32>
      %c0_20 = arith.constant 0 : index
      %c0_21 = arith.constant 0 : index
      %33 = vector.load %arg7[%c0_20, %c0_21] : memref<16x32xf32, #tpu.memory_space<vmem>>, vector<16x32xf32>
      tpu.vector_store %arg7[%c0_20, %c0_21], %32 {strides = array<i32>} : memref<16x32xf32, #tpu.memory_space<vmem>>, vector<16x32xf32>,
    } else {
    }
    return
  }
  func.func @transform_0(%arg0: i32, %arg1: i32) -> (i32, i32) {
    %c0_i32 = arith.constant 0 : i32
    %c0_i32_0 = arith.constant 0 : i32
    return %arg0, %c0_i32 : i32, i32
  }
  func.func @transform_1(%arg0: i32, %arg1: i32) -> (i32, i32) {
    %c0_i32 = arith.constant 0 : i32
    %c0_i32_0 = arith.constant 0 : i32
    %c0_i32_1 = arith.constant 0 : i32
    return %c0_i32, %c0_i32_0 : i32, i32
  }
  func.func @transform_2(%arg0: i32, %arg1: i32) -> (i32, i32) {
    %c0_i32 = arith.constant 0 : i32
    %c0_i32_0 = arith.constant 0 : i32
    return %c0_i32, %arg1 : i32, i32
  }
  func.func @transform_3(%arg0: i32, %arg1: i32) -> (i32, i32) {
    %c0_i32 = arith.constant 0 : i32
    %c0_i32_0 = arith.constant 0 : i32
    %c0_i32_1 = arith.constant 0 : i32
    return %c0_i32, %c0_i32_0 : i32, i32
  }
  func.func @transform_4(%arg0: i32, %arg1: i32) -> (i32, i32) {
    %c0_i32 = arith.constant 0 : i32
    %c0_i32_0 = arith.constant 0 : i32
    %c0_i32_1 = arith.constant 0 : i32
    return %c0_i32, %c0_i32_0 : i32, i32
  }
  func.func @transform_5(%arg0: i32, %arg1: i32) -> (i32, i32) {
    %c0_i32 = arith.constant 0 : i32
    %c0_i32_0 = arith.constant 0 : i32
    return %arg0, %c0_i32 : i32, i32
  }
}

</mosaic_0001>

<bundles_post_ra>
// kernel: bert_mlp.1
= control target key start
LH: loop header
LB: loop body
LE: loop exit
PB: predicated region body
PF: predicated region fallthrough
CT: control target
= control target key end

     0   :  { %vm25_vm0 = vcmask 261120   ;;  %s666_s0 = inlined_call_operand.vmem [shape: f32[16,32], index: 0, kind: input, shape index: {}]   ;;  %s667_s1 = inlined_call_operand.vmem [shape: f32[128,32], index: 1, kind: input, shape index: {}]   ;;  %s668_s2 = inlined_call_operand.vmem [shape: f32[1,128], index: 2, kind: input, shape index: {}]   ;;  %s669_s3 = inlined_call_operand.vmem [shape: f32[128,32], index: 3, kind: input, shape index: {}]   ;;  %s670_s4 = inlined_call_operand.vmem [shape: f32[1,32], index: 4, kind: input, shape index: {}]   ;;  %s671_s5 = inlined_call_operand.hbm [shape: f32[16,32], index: 5, kind: output, shape index: {}]  }
   0x1   :  { %v45_v0 = vld [vmem:[%s667_s1 + $0x78] sm:$0xff]  ;;  %v44_v1 = vld [vmem:[%s667_s1 + $0x70] sm:$0xff]  ;;  %v43_v2 = vld [vmem:[%s667_s1 + $0x68] sm:$0xff] }
   0x2   :  { %381 = vmatprep.subr.msk.mxu0 %vm25_vm0, %v45_v0  ;;  %v63_v3 = vld [vmem:[%s666_s0] sm:$0xff]  ;;  %v62_v4 = vld [vmem:[%s669_s3 + $0x78] sm:$0xff]  ;;  %v61_v5 = vld [vmem:[%s669_s3 + $0x70] sm:$0xff] }
   0x3   :  { %382 = vmatpush3.xpose.msk.msra.mxu0 %vm25_vm0, %v45_v0  ;;  %413 = vmatprep.mubr.msk.f32.mxu0 %vm25_vm0, %v63_v3 }
   0x4   :  { %383 = vmatprep.subr.msk.mxu0 %vm25_vm0, %v44_v1  ;;  %416 = vmatprep.subr.mxu1 %v62_v4 }
   0x7   :  { %384 = vmatpush3.xpose.msk.msra.mxu0 %vm25_vm0, %v44_v1 }
   0x8   :  { %385 = vmatprep.subr.msk.mxu0 %vm25_vm0, %v43_v2 }
   0x9   :  { %10 = vsyncpa [#allocation4], 0  ;;  %v42_v6 = vld [vmem:[%s667_s1 + $0x60] sm:$0xff]  ;;  %417 = vmatpush3.msra.mxu1 %v62_v4  ;;  %v60_v7 = vld [vmem:[%s669_s3 + $0x68] sm:$0xff]  ;;  %v481_v34 = vmov 0.0   ;;  %s482_s11 = smov [#allocation3]  }
   0xa   :  { %418 = vmatprep.subr.mxu1 %v61_v5  ;;  %v41_v8 = vld [vmem:[%s667_s1 + $0x58] sm:$0xff]  ;;  %v40_v9 = vld [vmem:[%s667_s1 + $0x50] sm:$0xff]  ;;  %v39_v10 = vld [vmem:[%s667_s1 + $0x48] sm:$0xff]  ;;  %27 = vst.msk [vmem:[#allocation2 + $0x8] sm:$0xff] %vm25_vm0, %v481_v34  ;;  %s314_s12 = sshll.u32 %s482_s11, 4  ;;  %s315_s12 = int_to_ptr.vmem [resolvable:$true] %s314_s12 }
   0xb   :  { %386 = vmatpush3.xpose.msk.msra.mxu0 %vm25_vm0, %v43_v2  ;;  %419 = vmatpush3.msra.mxu1 %v61_v5  ;;  %v38_v11 = vld [vmem:[%s667_s1 + $0x40] sm:$0xff]  ;;  %v37_v12 = vld [vmem:[%s667_s1 + $0x38] sm:$0xff]  ;;  %v36_v13 = vld [vmem:[%s667_s1 + $0x30] sm:$0xff]  ;;  %26 = vst.msk [vmem:[#allocation2] sm:$0xff] %vm25_vm0, %v481_v34  ;;  %p464_p1 = scmp.lt.s32.totalorder %s315_s12, %s315_s12 }
   0xc   :  { %387 = vmatprep.subr.msk.mxu0 %vm25_vm0, %v42_v6  ;;  %420 = vmatprep.subr.mxu1 %v60_v7  ;;  %v35_v14 = vld [vmem:[%s667_s1 + $0x28] sm:$0xff]  ;;  %v34_v15 = vld [vmem:[%s667_s1 + $0x20] sm:$0xff]  ;;  %v33_v16 = vld [vmem:[%s667_s1 + $0x18] sm:$0xff] }
   0xd   :  { %421 = vmatpush3.msra.mxu1 %v60_v7  ;;  %v32_v17 = vld [vmem:[%s667_s1 + $0x10] sm:$0xff]  ;;  %v31_v18 = vld [vmem:[%s667_s1 + $0x8] sm:$0xff]  ;;  %v30_v19 = vld [vmem:[%s667_s1] sm:$0xff]  ;;  %s459_s1 = scalar_lea.vmem %s315_s12, 256 }
   0xe   :  { %v64_v20 = vld [vmem:[%s666_s0 + $0x8] sm:$0xff]  ;;  %v59_v21 = vld [vmem:[%s669_s3 + $0x60] sm:$0xff]  ;;  %v58_v22 = vld [vmem:[%s669_s3 + $0x58] sm:$0xff]  ;;  %p460_p0 = scmp.ne.s32.totalorder %s315_s12, %s459_s1  ;;  %p465_p2 = scmp.lt.s32.totalorder %s459_s1, %s459_s1 }
   0xf   :  { %388 = vmatpush3.xpose.msk.msra.mxu0 %vm25_vm0, %v42_v6  ;;  %422 = vmatprep.subr.mxu1 %v59_v21  ;;  %v57_v23 = vld [vmem:[%s669_s3 + $0x50] sm:$0xff]  ;;  %v56_v24 = vld [vmem:[%s669_s3 + $0x48] sm:$0xff]  ;;  %v55_v25 = vld [vmem:[%s669_s3 + $0x40] sm:$0xff] }
  0x10   :  { %389 = vmatprep.subr.msk.mxu0 %vm25_vm0, %v41_v8  ;;  %423 = vmatpush3.msra.mxu1 %v59_v21  ;;  %v54_v26 = vld [vmem:[%s669_s3 + $0x38] sm:$0xff]  ;;  %v53_v27 = vld [vmem:[%s669_s3 + $0x30] sm:$0xff]  ;;  %v52_v28 = vld [vmem:[%s669_s3 + $0x28] sm:$0xff]  ;;  %p466_p3 = por %p465_p2, %p464_p1 }
  0x11   :  { %424 = vmatprep.subr.mxu1 %v58_v22  ;;  %v51_v29 = vld [vmem:[%s669_s3 + $0x20] sm:$0xff]  ;;  %v50_v30 = vld [vmem:[%s669_s3 + $0x18] sm:$0xff]  ;;  %v49_v31 = vld [vmem:[%s669_s3 + $0x10] sm:$0xff] }
  0x12   :  { %425 = vmatpush3.msra.mxu1 %v58_v22  ;;  %v48_v32 = vld [vmem:[%s669_s3 + $0x8] sm:$0xff]  ;;  %v47_v33 = vld [vmem:[%s669_s3] sm:$0xff]  ;;  %p467_p4 = pnand %p466_p3, %p460_p0 }
  0x13   :  { %390 = vmatpush3.xpose.msk.msra.mxu0 %vm25_vm0, %v41_v8  ;;  %426 = vmatprep.subr.mxu1 %v57_v23  ;;  %v325_v35 = vld [vmem:[%s668_s2] ss:$0 sm:$0xff]  ;;  %v213_v50 = vld [vmem:[#allocation2 + $0x8] sm:$0xff] }
  0x14   :  { %391 = vmatprep.subr.msk.mxu0 %vm25_vm0, %v40_v9  ;;  %427 = vmatpush3.msra.mxu1 %v57_v23  ;;  %v212_v52 = vld [vmem:[#allocation2] sm:$0xff] }
  0x15   :  { %428 = vmatprep.subr.mxu1 %v56_v24  ;;  %v344_v56 = vld [vmem:[%s670_s4] ss:$0 sm:$0xff] }
  0x16   :  { %429 = vmatpush3.msra.mxu1 %v56_v24 }
  0x17   :  { %392 = vmatpush3.xpose.msk.msra.mxu0 %vm25_vm0, %v40_v9  ;;  %430 = vmatprep.subr.mxu1 %v55_v25 }
  0x18   :  { %393 = vmatprep.subr.msk.mxu0 %vm25_vm0, %v39_v10  ;;  %431 = vmatpush3.msra.mxu1 %v55_v25 }
  0x19   :  { %432 = vmatprep.subr.mxu1 %v54_v26 }
  0x1a   :  { %433 = vmatpush3.msra.mxu1 %v54_v26 }
  0x1b   :  { %394 = vmatpush3.xpose.msk.msra.mxu0 %vm25_vm0, %v39_v10  ;;  %434 = vmatprep.subr.mxu1 %v53_v27 }
  0x1c   :  { %395 = vmatprep.subr.msk.mxu0 %vm25_vm0, %v38_v11  ;;  %435 = vmatpush3.msra.mxu1 %v53_v27 }
  0x1d   :  { %436 = vmatprep.subr.mxu1 %v52_v28 }
  0x1e   :  { %437 = vmatpush3.msra.mxu1 %v52_v28 }
  0x1f   :  { %396 = vmatpush3.xpose.msk.msra.mxu0 %vm25_vm0, %v38_v11  ;;  %438 = vmatprep.subr.mxu1 %v51_v29 }
  0x20   :  { %397 = vmatprep.subr.msk.mxu0 %vm25_vm0, %v37_v12  ;;  %439 = vmatpush3.msra.mxu1 %v51_v29 }
  0x21   :  { %440 = vmatprep.subr.mxu1 %v50_v30 }
  0x22   :  { %441 = vmatpush3.msra.mxu1 %v50_v30 }
  0x23   :  { %398 = vmatpush3.xpose.msk.msra.mxu0 %vm25_vm0, %v37_v12  ;;  %442 = vmatprep.subr.mxu1 %v49_v31 }
  0x24   :  { %399 = vmatprep.subr.msk.mxu0 %vm25_vm0, %v36_v13  ;;  %443 = vmatpush3.msra.mxu1 %v49_v31 }
  0x25   :  { %444 = vmatprep.subr.mxu1 %v48_v32 }
  0x26   :  { %445 = vmatpush3.msra.mxu1 %v48_v32 }
  0x27   :  { %400 = vmatpush3.xpose.msk.msra.mxu0 %vm25_vm0, %v36_v13  ;;  %446 = vmatprep.subr.mxu1 %v47_v33 }
  0x28   :  { %401 = vmatprep.subr.msk.mxu0 %vm25_vm0, %v35_v14  ;;  %447 = vmatpush3.msra.mxu1 %v47_v33 }
  0x2b   :  { %402 = vmatpush3.xpose.msk.msra.mxu0 %vm25_vm0, %v35_v14 }
  0x2c   :  { %403 = vmatprep.subr.msk.mxu0 %vm25_vm0, %v34_v15 }
  0x2f   :  { %404 = vmatpush3.xpose.msk.msra.mxu0 %vm25_vm0, %v34_v15 }
  0x30   :  { %405 = vmatprep.subr.msk.mxu0 %vm25_vm0, %v33_v16 }
  0x33   :  { %406 = vmatpush3.xpose.msk.msra.mxu0 %vm25_vm0, %v33_v16 }
  0x34   :  { %407 = vmatprep.subr.msk.mxu0 %vm25_vm0, %v32_v17 }
  0x37   :  { %408 = vmatpush3.xpose.msk.msra.mxu0 %vm25_vm0, %v32_v17 }
  0x38   :  { %409 = vmatprep.subr.msk.mxu0 %vm25_vm0, %v31_v18 }
  0x3b   :  { %410 = vmatpush3.xpose.msk.msra.mxu0 %vm25_vm0, %v31_v18 }
  0x3c   :  { %411 = vmatprep.subr.msk.mxu0 %vm25_vm0, %v30_v19 }
  0x3f   :  { %412 = vmatpush3.xpose.msk.msra.mxu0 %vm25_vm0, %v30_v19 }
  0x42   :  { %414 = vmatmul.mubr.msk.f32.vlgmr.msra.gmra.mxu0 %vm25_vm0, %v64_v20 }
 0x102   :  { %v415_v36 = vpop.f32.mrf.mxu0 }
 0x103   :  { %v199_v37 = vadd.f32 %v415_v36, %v325_v35 }
 0x104   :  { %v193_v38 = vpop.f32.mrf.mxu0 }
 0x105   :  { %v205_v39 = vmul.f32 0.70710677, %v199_v37  ;;  %v194_v40 = vadd.f32 %v325_v35, %v193_v38  ;;  %v203_v47 = vmul.f32 0.5, %v199_v37 }
 0x107   :  { %455 = verf.f32 %v205_v39  ;;  %v204_v41 = vmul.f32 0.70710677, %v194_v40  ;;  %v202_v45 = vmul.f32 0.5, %v194_v40 }
 0x109   :  { %457 = verf.f32 %v204_v41 }
 0x114   :  { %v456_v42 = vpop.eup %455 }
 0x115   :  { %v209_v44 = vadd.f32 1.0, %v456_v42 }
 0x116   :  { %v458_v43 = vpop.eup %457 }
 0x117   :  { %v208_v46 = vadd.f32 1.0, %v458_v43  ;;  %v211_v49 = vmul.f32 %v209_v44, %v203_v47 }
 0x119   :  { %v210_v48 = vmul.f32 %v208_v46, %v202_v45 }
 0x11b   :  { %448 = vmatprep.mubr.f32.mxu1 %v210_v48 }
 0x11c   :  { %449 = vmatmul.mubr.f32.vlgmr.msra.gmra.mxu1 %v211_v49 }
 0x1dc   :  { %v450_v51 = vpop.f32.mrf.mxu1 }
 0x1dd   :  { %v290_v53 = vadd.f32 %v450_v51, %v213_v50 }
 0x1de   :  { %v280_v54 = vpop.f32.mrf.mxu1 }
 0x1df   :  { %292 = vst.msk [vmem:[#allocation2 + $0x8] sm:$0xff] %vm25_vm0, %v290_v53  ;;  %v289_v55 = vadd.f32 %v280_v54, %v212_v52 }
 0x1e1   :  { %291 = vst.msk [vmem:[#allocation2] sm:$0xff] %vm25_vm0, %v289_v55 }
 0x1e6   :  { %v297_v57 = vld [vmem:[#allocation2 + $0x8] sm:$0xff] }
 0x1e7   :  { %v306_v58 = vadd.f32 %v344_v56, %v297_v57 }
 0x1e8   :  { %v296_v59 = vld [vmem:[#allocation2] sm:$0xff] }
 0x1e9   :  { %v305_v60 = vadd.f32 %v344_v56, %v296_v59  ;;  %308 = vst.msk [vmem:[#allocation3 + $0x8] sm:$0xff] %vm25_vm0, %v306_v58 }
 0x1eb   :  { %307 = vst.msk [vmem:[#allocation3] sm:$0xff] %vm25_vm0, %v305_v60 }
 0x1ec   :  { %470 = shalt.err (!%p467_p4)
}
 0x1ed   :  { %s483_s13 = smov 128   ;;  %s484_s4 = smov 8  }
 0x1ee   :  { %320 = dma.vmem_to_hbm [thread:$0]  %s315_s12, 256, %s671_s5, [#allocation4], %s483_s13, %s483_s13, %s484_s4  }
 0x1ef   :  { %479 = dma.done.wait [#allocation4], 256  }
 0x1f0   :  { %480 = vsyncadd [#allocation4], 4294967040 }
 0x1f1   :  { %324 = vsyncpa [#allocation4], 1 }

</bundles_post_ra>
